<compile_context>
chip_gen: v7x
topology: tpu7x:2x2x1
jax: 0.10.0
libtpu: 0.0.40
codegen_flags: <defaults>
</compile_context>

<pallas_src>
import functools
import math

import jax
import jax.numpy as jnp
from jax import lax
from jax.experimental import pallas as pl
from jax.experimental.pallas import tpu as pltpu

TREND_LOSS_WEIGHT = 0.2

_POS_DIM = 6          # pred[:, :6] / target[:, :6] (falls back to next_target width)
_MOVE_FRAMES = 5      # student_input[:, -5:, :]
_MOVE_FEATS = 16      # student_input[..., :16]
_MOVE_THRESHOLD = 0.05
_NORM_EPS = 1e-12     # torch.nn.functional.normalize default eps

_LANE = 128
_SUBLANE = 8
# Per-grid-step input-tile budget (single-buffered); the pipeline double
# buffers so real use is ~2x this, comfortably inside the 32 MiB limit we
# request below on every TPU generation (v5e/v6e 128 MiB, v7x 64 MiB physical).
_TILE_BUDGET_BYTES = 6 * 1024 * 1024
_VMEM_LIMIT_BYTES = 32 * 1024 * 1024


def _round_up(x, m):
    return ((x + m - 1) // m) * m


def _cdiv(a, b):
    return -(-a // b)


def _trend_loss_kernel(*refs, trend_on, has_student, n_frames, n_feats):
    if trend_on and has_student:
        (sqp_ref, sqt_ref, pp_ref, pt_ref, nx_ref, mv_ref,
         osq_ref, ocos_ref, omov_ref, a_sq, a_cos, a_mov) = refs
    elif trend_on:
        (sqp_ref, sqt_ref, pp_ref, pt_ref, nx_ref,
         osq_ref, ocos_ref, omov_ref, a_sq, a_cos, a_mov) = refs
        mv_ref = None
    else:
        (sqp_ref, sqt_ref,
         osq_ref, ocos_ref, omov_ref, a_sq, a_cos, a_mov) = refs
        pp_ref = pt_ref = nx_ref = mv_ref = None

    i = pl.program_id(1)            # reduction ("arbitrary") axis within this split

    @pl.when(i == 0)
    def _init():
        a_sq[...] = jnp.zeros_like(a_sq)
        a_cos[...] = jnp.zeros_like(a_cos)
        a_mov[...] = jnp.zeros_like(a_mov)

    # ---- squared-error stream: lane-dense (rows, 128) tiles of the flattened
    # pred/target (zero-padded rows are zero in both -> contribute 0). ----
    dp = sqp_ref[...].astype(jnp.float32) - sqt_ref[...].astype(jnp.float32)
    a_sq[...] += jnp.sum(dp * dp, keepdims=True)                 # (1, 1)

    if trend_on:
        nxt = nx_ref[...].astype(jnp.float32)                    # (tb, pos)
        p2n = nxt - pp_ref[...].astype(jnp.float32)
        t2n = nxt - pt_ref[...].astype(jnp.float32)
        dot = jnp.sum(p2n * t2n, axis=1, keepdims=True)          # (tb, 1)
        p_sq = jnp.sum(p2n * p2n, axis=1, keepdims=True)
        t_sq = jnp.sum(t2n * t2n, axis=1, keepdims=True)
        eps2 = jnp.float32(_NORM_EPS * _NORM_EPS)
        # cos of L2-normalized vectors == dot / (max(|p|,eps)*max(|t|,eps));
        # rsqrt lands in the EUP slot (no VPU sqrt + divide).
        cos = dot * lax.rsqrt(jnp.maximum(p_sq, eps2)) * lax.rsqrt(jnp.maximum(t_sq, eps2))
        a_cos[...] += jnp.sum(cos, keepdims=True)                # (1, 1)

        if has_student:
            mv = mv_ref[...].astype(jnp.float32)                 # (tb, n_frames*n_feats)
            width = (n_frames - 1) * n_feats
            # Frame-to-frame diff via a lane shift of n_feats (frames are
            # contiguous groups of n_feats lanes after the wrapper reshape).
            d = mv[:, n_feats:] - mv[:, :width]                  # (tb, width)
            d2 = d * d
            mov_sum = jnp.zeros((1, 1), jnp.float32)
            for f in range(n_frames - 1):                        # tiny static loop (<=4)
                seg = d2[:, f * n_feats:(f + 1) * n_feats]
                norms = jnp.sqrt(jnp.sum(seg, axis=1, keepdims=True))   # (tb, 1)
                mov_sum = mov_sum + jnp.sum(norms, keepdims=True)
            a_mov[...] += mov_sum                                # (1, 1)

    @pl.when(i == pl.num_programs(1) - 1)
    def _finalize():
        osq_ref[...] = a_sq[...].reshape(1, 1, 1)
        ocos_ref[...] = a_cos[...].reshape(1, 1, 1)
        omov_ref[...] = a_mov[...].reshape(1, 1, 1)


def trend_aware_loss(pred, target, next_target, student_input=None,
                     mse_weight=1.0, trend_weight=TREND_LOSS_WEIGHT,
                     tile_budget_bytes=_TILE_BUDGET_BYTES):
    """Mirror of TrendAwareLoss(mse_weight, trend_weight).forward(...). Returns a scalar."""
    batch, out_dim = pred.shape
    trend_on = float(trend_weight) > 0.0
    has_student = (student_input is not None) and trend_on and student_input.shape[1] >= 2
    pos_dim = next_target.shape[1]

    # ---- wrapper-side trimming of student_input (only last 5 frames x 16 feats used) ----
    n_frames = n_feats = 1
    mov = None
    if has_student:
        s_len, in_dim = student_input.shape[1], student_input.shape[2]
        n_frames = min(_MOVE_FRAMES, s_len)
        n_feats = min(_MOVE_FEATS, in_dim)
        mov = student_input[:, s_len - n_frames:, :n_feats].reshape(batch, n_frames * n_feats)

    # ---- tile sizing from a VMEM budget ----
    isz = jnp.dtype(pred.dtype).itemsize
    row_bytes = 2 * out_dim * isz
    if trend_on:
        row_bytes += 3 * pos_dim * isz
        if has_student:
            row_bytes += n_frames * n_feats * jnp.dtype(student_input.dtype).itemsize

    # Alignment: the flattened B*out_dim stream must fold into whole 128-lane
    # rows; for multi-tile grids every tile's sublane count must divide by 8.
    a_single = _LANE // math.gcd(out_dim, _LANE)
    a_multi = max(_SUBLANE, (_SUBLANE * _LANE) // math.gcd(out_dim, _SUBLANE * _LANE))

    tb_budget = max(tile_budget_bytes // max(row_bytes, 1), 1)
    tb_cap = max((tb_budget // a_multi) * a_multi, a_multi)

    if batch <= tb_cap:
        # Single tile: all blocks equal the full (padded) array dims.
        b_pad = _round_up(batch, a_single)
        tb = b_pad
        n_tiles = 1
        n_splits = 1
    else:
        n_tiles = _cdiv(batch, tb_cap)          # >= 2 here
        n_splits = 2                            # v7x: one split per TensorCore
        n_tiles = _round_up(n_tiles, n_splits)
        tb = _round_up(_cdiv(batch, n_tiles), a_multi)
        b_pad = n_tiles * tb
    tiles_per_split = n_tiles // n_splits

    def _pad_rows(x):
        if x.shape[0] == b_pad:
            return x
        return jnp.pad(x, ((0, b_pad - x.shape[0]),) + ((0, 0),) * (x.ndim - 1))

    pred_p = _pad_rows(pred)
    targ_p = _pad_rows(target)
    rows_sq = (b_pad * out_dim) // _LANE
    sq_rows_per_tile = (tb * out_dim) // _LANE
    pred_sq = pred_p.reshape(rows_sq, _LANE)       # free contiguous reshape
    targ_sq = targ_p.reshape(rows_sq, _LANE)

    tile_idx = lambda c, i: (c * tiles_per_split + i, 0)

    args = [pred_sq, targ_sq]
    in_specs = [pl.BlockSpec((sq_rows_per_tile, _LANE), tile_idx),
                pl.BlockSpec((sq_rows_per_tile, _LANE), tile_idx)]
    if trend_on:
        args += [pred_p[:, :pos_dim], targ_p[:, :pos_dim], _pad_rows(next_target)]
        pos_spec = pl.BlockSpec((tb, pos_dim), tile_idx)
        in_specs += [pos_spec, pos_spec, pos_spec]
        if has_student:
            args.append(_pad_rows(mov))
            in_specs.append(pl.BlockSpec((tb, n_frames * n_feats), tile_idx))

    kernel = functools.partial(
        _trend_loss_kernel, trend_on=trend_on, has_student=has_student,
        n_frames=n_frames, n_feats=n_feats)

    out_spec = pl.BlockSpec((1, 1, 1), lambda c, i: (c, 0, 0))
    psq, pcos, pmov = pl.pallas_call(
        kernel,
        out_shape=(jax.ShapeDtypeStruct((n_splits, 1, 1), jnp.float32),
                   jax.ShapeDtypeStruct((n_splits, 1, 1), jnp.float32),
                   jax.ShapeDtypeStruct((n_splits, 1, 1), jnp.float32)),
        grid_spec=pltpu.PrefetchScalarGridSpec(
            num_scalar_prefetch=0,
            grid=(n_splits, tiles_per_split),
            in_specs=in_specs,
            out_specs=[out_spec, out_spec, out_spec],
            scratch_shapes=[pltpu.VMEM((1, 1), jnp.float32),
                            pltpu.VMEM((1, 1), jnp.float32),
                            pltpu.VMEM((1, 1), jnp.float32)],
        ),
        compiler_params=pltpu.CompilerParams(
            dimension_semantics=("parallel", "arbitrary"),
            vmem_limit_bytes=_VMEM_LIMIT_BYTES),
    )(*args)

    # ---- final scalar math (trivial; stays in XLA) ----
    mse_loss = jnp.sum(psq) / float(batch * out_dim)
    if not trend_on:
        return mse_loss                          # module returns unweighted MSE here
    direction_loss = 1.0 - jnp.sum(pcos) / float(batch)
    if has_student:
        movement = jnp.sum(pmov) / float(batch * (n_frames - 1))
        movement_weight = jnp.exp(-movement / _MOVE_THRESHOLD)
    else:
        movement_weight = 1.0
    return (float(mse_weight) * mse_loss
            + float(trend_weight) * movement_weight * direction_loss)


def _reference_loss(pred, target, next_target, student_input=None,
                    mse_weight=1.0, trend_weight=TREND_LOSS_WEIGHT):
    """Pure-JAX reference matching the PyTorch forward."""
    mse_loss = jnp.mean((pred - target) ** 2)
    if trend_weight <= 0.0:
        return mse_loss
    pos_dim = next_target.shape[1]
    p2n = next_target - pred[:, :pos_dim]
    t2n = next_target - target[:, :pos_dim]

    def _normalize(x):
        n = jnp.sqrt(jnp.sum(x * x, axis=1, keepdims=True))
        return x / jnp.maximum(n, _NORM_EPS)

    cos_sim = jnp.sum(_normalize(p2n) * _normalize(t2n), axis=1)
    direction_loss = 1.0 - jnp.mean(cos_sim)
    movement_weight = 1.0
    if student_input is not None:
        last = student_input[:, -_MOVE_FRAMES:, :_MOVE_FEATS]
        d = last[:, 1:] - last[:, :-1]
        movement = jnp.mean(jnp.sqrt(jnp.sum(d * d, axis=2)))
        movement_weight = jnp.exp(-movement / _MOVE_THRESHOLD)
    return mse_weight * mse_loss + trend_weight * movement_weight * direction_loss


if __name__ == "__main__":
    key = jax.random.PRNGKey(0)
    k1, k2, k3, k4 = jax.random.split(key, 4)
    batch, out_dim, seq_len, in_dim = 2, 32, 8, 32

    pred = jax.random.normal(k1, (batch, out_dim), dtype=jnp.float32)
    target = jax.random.normal(k2, (batch, out_dim), dtype=jnp.float32)
    next_target = jax.random.normal(k3, (batch, _POS_DIM), dtype=jnp.float32)
    student_input = jax.random.normal(k4, (batch, seq_len, in_dim), dtype=jnp.float32)

    # 1) Full path: MSE + trend + movement weighting.
    loss = jax.block_until_ready(trend_aware_loss(pred, target, next_target, student_input))
    ref = _reference_loss(pred, target, next_target, student_input)
    assert loss.shape == ()
    assert jnp.allclose(loss, ref, atol=1e-5, rtol=1e-5), (loss, ref)

    # 2) No student_input (movement_weight = 1.0).
    loss_ns = jax.block_until_ready(trend_aware_loss(pred, target, next_target, None))
    ref_ns = _reference_loss(pred, target, next_target, None)
    assert jnp.allclose(loss_ns, ref_ns, atol=1e-5, rtol=1e-5), (loss_ns, ref_ns)

    # 3) trend_weight <= 0 -> plain MSE.
    loss_mse = jax.block_until_ready(
        trend_aware_loss(pred, target, next_target, student_input, trend_weight=0.0))
    ref_mse = _reference_loss(pred, target, next_target, student_input, trend_weight=0.0)
    assert jnp.allclose(loss_mse, ref_mse, atol=1e-6, rtol=1e-6), (loss_mse, ref_mse)

    # 4) Multi-tile + 2-way split path (tiny tile budget forces grid > (1,1),
    #    a non-multiple-of-tile batch exercises the zero-pad tail handling).
    kb1, kb2, kb3, kb4 = jax.random.split(jax.random.PRNGKey(1), 4)
    b2 = 600
    pred2 = jax.random.normal(kb1, (b2, out_dim), dtype=jnp.float32)
    target2 = jax.random.normal(kb2, (b2, out_dim), dtype=jnp.float32)
    next2 = jax.random.normal(kb3, (b2, _POS_DIM), dtype=jnp.float32)
    stu2 = jax.random.normal(kb4, (b2, seq_len, in_dim), dtype=jnp.float32)
    loss2 = jax.block_until_ready(
        trend_aware_loss(pred2, target2, next2, stu2, tile_budget_bytes=64 * 1024))
    ref2 = _reference_loss(pred2, target2, next2, stu2)
    assert jnp.allclose(loss2, ref2, atol=1e-5, rtol=1e-5), (loss2, ref2)

    print("KERNEL_OK")
</pallas_src>

<mosaic_0001>
module attributes {stable_mosaic.version = 11 : i64} {
  func.func @_trend_loss_kernel(%arg0: i32, %arg1: i32, %arg2: memref<1x128xf32, #tpu.memory_space<vmem>>, %arg3: memref<1x128xf32, #tpu.memory_space<vmem>>, %arg4: memref<4x6xf32, #tpu.memory_space<vmem>>, %arg5: memref<4x6xf32, #tpu.memory_space<vmem>>, %arg6: memref<4x6xf32, #tpu.memory_space<vmem>>, %arg7: memref<4x80xf32, #tpu.memory_space<vmem>>, %arg8: memref<1x1x1xf32, #tpu.memory_space<vmem>>, %arg9: memref<1x1x1xf32, #tpu.memory_space<vmem>>, %arg10: memref<1x1x1xf32, #tpu.memory_space<vmem>>, %arg11: memref<1x1xf32, #tpu.memory_space<vmem>>, %arg12: memref<1x1xf32, #tpu.memory_space<vmem>>, %arg13: memref<1x1xf32, #tpu.memory_space<vmem>>) attributes {dimension_semantics = [#tpu.dimension_semantics<parallel>, #tpu.dimension_semantics<arbitrary>], iteration_bounds = array<i64: 1, 1>, scalar_prefetch = 0 : i64, scratch_operands = 3 : i64, tpu.core_type = #tpu.core_type<tc>, window_params = [{transform_indices = @transform_0, window_bounds = array<i64: 1, 128>}, {transform_indices = @transform_1, window_bounds = array<i64: 1, 128>}, {transform_indices = @transform_2, window_bounds = array<i64: 4, 6>}, {transform_indices = @transform_3, window_bounds = array<i64: 4, 6>}, {transform_indices = @transform_4, window_bounds = array<i64: 4, 6>}, {transform_indices = @transform_5, window_bounds = array<i64: 4, 80>}, {transform_indices = @transform_6, window_bounds = array<i64: 1, 1, 1>}, {transform_indices = @transform_7, window_bounds = array<i64: 1, 1, 1>}, {transform_indices = @transform_8, window_bounds = array<i64: 1, 1, 1>}]} {
    %c0_i32 = arith.constant 0 : i32
    %0 = arith.cmpi eq, %arg1, %c0_i32 : i32
    %1 = arith.extui %0 : i1 to i32
    %c0_i32_0 = arith.constant 0 : i32
    %2 = arith.cmpi ne, %1, %c0_i32_0 : i32
    scf.if %2 {
      %cst_41 = arith.constant 0.000000e+00 : f32
      %97 = vector.broadcast %cst_41 : f32 to vector<1x1xf32>
      %c0_42 = arith.constant 0 : index
      %c0_43 = arith.constant 0 : index
      %98 = vector.load %arg11[%c0_42, %c0_43] : memref<1x1xf32, #tpu.memory_space<vmem>>, vector<1x1xf32>
      tpu.vector_store %arg11[%c0_42, %c0_43], %97 {strides = array<i32>} : memref<1x1xf32, #tpu.memory_space<vmem>>, vector<1x1xf32>,
      %cst_44 = arith.constant 0.000000e+00 : f32
      %99 = vector.broadcast %cst_44 : f32 to vector<1x1xf32>
      %c0_45 = arith.constant 0 : index
      %c0_46 = arith.constant 0 : index
      %100 = vector.load %arg12[%c0_45, %c0_46] : memref<1x1xf32, #tpu.memory_space<vmem>>, vector<1x1xf32>
      tpu.vector_store %arg12[%c0_45, %c0_46], %99 {strides = array<i32>} : memref<1x1xf32, #tpu.memory_space<vmem>>, vector<1x1xf32>,
      %cst_47 = arith.constant 0.000000e+00 : f32
      %101 = vector.broadcast %cst_47 : f32 to vector<1x1xf32>
      %c0_48 = arith.constant 0 : index
      %c0_49 = arith.constant 0 : index
      %102 = vector.load %arg13[%c0_48, %c0_49] : memref<1x1xf32, #tpu.memory_space<vmem>>, vector<1x1xf32>
      tpu.vector_store %arg13[%c0_48, %c0_49], %101 {strides = array<i32>} : memref<1x1xf32, #tpu.memory_space<vmem>>, vector<1x1xf32>,
    } else {
    }
    %c0 = arith.constant 0 : index
    %c0_1 = arith.constant 0 : index
    %3 = vector.load %arg2[%c0, %c0_1] : memref<1x128xf32, #tpu.memory_space<vmem>>, vector<1x128xf32>
    %c0_2 = arith.constant 0 : index
    %c0_3 = arith.constant 0 : index
    %4 = vector.load %arg3[%c0_2, %c0_3] : memref<1x128xf32, #tpu.memory_space<vmem>>, vector<1x128xf32>
    %5 = arith.subf %3, %4 : vector<1x128xf32>
    %c0_4 = arith.constant 0 : index
    %c0_5 = arith.constant 0 : index
    %6 = vector.load %arg11[%c0_4, %c0_5] : memref<1x1xf32, #tpu.memory_space<vmem>>, vector<1x1xf32>
    %7 = arith.mulf %5, %5 : vector<1x128xf32>
    %8 = vector.shape_cast %7 : vector<1x128xf32> to vector<1x1x128xf32>
    %cst = arith.constant dense<0.000000e+00> : vector<1xf32>
    %9 = vector.multi_reduction <add>, %8, %cst [1, 2] : vector<1x1x128xf32> to vector<1xf32>
    %10 = vector.shape_cast %9 : vector<1xf32> to vector<1x1x1xf32>
    %11 = vector.extract %10[0, 0, 0] : f32 from vector<1x1x1xf32>
    %12 = vector.broadcast %11 : f32 to vector<1x1xf32>
    %13 = arith.addf %6, %12 : vector<1x1xf32>
    %c0_6 = arith.constant 0 : index
    %c0_7 = arith.constant 0 : index
    %14 = vector.load %arg11[%c0_6, %c0_7] : memref<1x1xf32, #tpu.memory_space<vmem>>, vector<1x1xf32>
    tpu.vector_store %arg11[%c0_6, %c0_7], %13 {strides = array<i32>} : memref<1x1xf32, #tpu.memory_space<vmem>>, vector<1x1xf32>,
    %c0_8 = arith.constant 0 : index
    %c0_9 = arith.constant 0 : index
    %15 = vector.load %arg6[%c0_8, %c0_9] : memref<4x6xf32, #tpu.memory_space<vmem>>, vector<4x6xf32>
    %c0_10 = arith.constant 0 : index
    %c0_11 = arith.constant 0 : index
    %16 = vector.load %arg4[%c0_10, %c0_11] : memref<4x6xf32, #tpu.memory_space<vmem>>, vector<4x6xf32>
    %17 = arith.subf %15, %16 : vector<4x6xf32>
    %c0_12 = arith.constant 0 : index
    %c0_13 = arith.constant 0 : index
    %18 = vector.load %arg5[%c0_12, %c0_13] : memref<4x6xf32, #tpu.memory_space<vmem>>, vector<4x6xf32>
    %19 = arith.subf %15, %18 : vector<4x6xf32>
    %20 = arith.mulf %17, %19 : vector<4x6xf32>
    %cst_14 = arith.constant dense<0.000000e+00> : vector<4xf32>
    %21 = vector.multi_reduction <add>, %20, %cst_14 [1] : vector<4x6xf32> to vector<4xf32>
    %22 = vector.shape_cast %21 : vector<4xf32> to vector<4x1xf32>
    %23 = arith.mulf %17, %17 : vector<4x6xf32>
    %cst_15 = arith.constant dense<0.000000e+00> : vector<4xf32>
    %24 = vector.multi_reduction <add>, %23, %cst_15 [1] : vector<4x6xf32> to vector<4xf32>
    %25 = vector.shape_cast %24 : vector<4xf32> to vector<4x1xf32>
    %26 = arith.mulf %19, %19 : vector<4x6xf32>
    %cst_16 = arith.constant dense<0.000000e+00> : vector<4xf32>
    %27 = vector.multi_reduction <add>, %26, %cst_16 [1] : vector<4x6xf32> to vector<4xf32>
    %28 = vector.shape_cast %27 : vector<4xf32> to vector<4x1xf32>
    %cst_17 = arith.constant 1.000000e-24 : f32
    %29 = vector.broadcast %cst_17 : f32 to vector<4x1xf32>
    %30 = arith.maximumf %25, %29 : vector<4x1xf32>
    %31 = math.rsqrt %30 : vector<4x1xf32>
    %32 = arith.mulf %22, %31 : vector<4x1xf32>
    %cst_18 = arith.constant 1.000000e-24 : f32
    %33 = vector.broadcast %cst_18 : f32 to vector<4x1xf32>
    %34 = arith.maximumf %28, %33 : vector<4x1xf32>
    %35 = math.rsqrt %34 : vector<4x1xf32>
    %36 = arith.mulf %32, %35 : vector<4x1xf32>
    %c0_19 = arith.constant 0 : index
    %c0_20 = arith.constant 0 : index
    %37 = vector.load %arg12[%c0_19, %c0_20] : memref<1x1xf32, #tpu.memory_space<vmem>>, vector<1x1xf32>
    %38 = vector.shape_cast %36 : vector<4x1xf32> to vector<1x4x1xf32>
    %cst_21 = arith.constant dense<0.000000e+00> : vector<1xf32>
    %39 = vector.multi_reduction <add>, %38, %cst_21 [1, 2] : vector<1x4x1xf32> to vector<1xf32>
    %40 = vector.shape_cast %39 : vector<1xf32> to vector<1x1x1xf32>
    %41 = vector.extract %40[0, 0, 0] : f32 from vector<1x1x1xf32>
    %42 = vector.broadcast %41 : f32 to vector<1x1xf32>
    %43 = arith.addf %37, %42 : vector<1x1xf32>
    %c0_22 = arith.constant 0 : index
    %c0_23 = arith.constant 0 : index
    %44 = vector.load %arg12[%c0_22, %c0_23] : memref<1x1xf32, #tpu.memory_space<vmem>>, vector<1x1xf32>
    tpu.vector_store %arg12[%c0_22, %c0_23], %43 {strides = array<i32>} : memref<1x1xf32, #tpu.memory_space<vmem>>, vector<1x1xf32>,
    %c0_24 = arith.constant 0 : index
    %c0_25 = arith.constant 0 : index
    %45 = vector.load %arg7[%c0_24, %c0_25] : memref<4x80xf32, #tpu.memory_space<vmem>>, vector<4x80xf32>
    %46 = vector.extract_strided_slice %45 {offsets = [0, 16], sizes = [4, 64], strides = [1, 1]} : vector<4x80xf32> to vector<4x64xf32>
    %47 = vector.extract_strided_slice %45 {offsets = [0, 0], sizes = [4, 64], strides = [1, 1]} : vector<4x80xf32> to vector<4x64xf32>
    %48 = arith.subf %46, %47 : vector<4x64xf32>
    %49 = arith.mulf %48, %48 : vector<4x64xf32>
    %cst_26 = arith.constant 0.000000e+00 : f32
    %50 = vector.broadcast %cst_26 : f32 to vector<1x1xf32>
    %51 = vector.extract_strided_slice %49 {offsets = [0, 0], sizes = [4, 16], strides = [1, 1]} : vector<4x64xf32> to vector<4x16xf32>
    %cst_27 = arith.constant dense<0.000000e+00> : vector<4xf32>
    %52 = vector.multi_reduction <add>, %51, %cst_27 [1] : vector<4x16xf32> to vector<4xf32>
    %53 = vector.shape_cast %52 : vector<4xf32> to vector<4x1xf32>
    %54 = math.sqrt %53 : vector<4x1xf32>
    %55 = vector.shape_cast %54 : vector<4x1xf32> to vector<1x4x1xf32>
    %cst_28 = arith.constant dense<0.000000e+00> : vector<1xf32>
    %56 = vector.multi_reduction <add>, %55, %cst_28 [1, 2] : vector<1x4x1xf32> to vector<1xf32>
    %57 = vector.shape_cast %56 : vector<1xf32> to vector<1x1x1xf32>
    %58 = vector.extract %57[0, 0, 0] : f32 from vector<1x1x1xf32>
    %59 = vector.broadcast %58 : f32 to vector<1x1xf32>
    %60 = arith.addf %50, %59 : vector<1x1xf32>
    %61 = vector.extract_strided_slice %49 {offsets = [0, 16], sizes = [4, 16], strides = [1, 1]} : vector<4x64xf32> to vector<4x16xf32>
    %cst_29 = arith.constant dense<0.000000e+00> : vector<4xf32>
    %62 = vector.multi_reduction <add>, %61, %cst_29 [1] : vector<4x16xf32> to vector<4xf32>
    %63 = vector.shape_cast %62 : vector<4xf32> to vector<4x1xf32>
    %64 = math.sqrt %63 : vector<4x1xf32>
    %65 = vector.shape_cast %64 : vector<4x1xf32> to vector<1x4x1xf32>
    %cst_30 = arith.constant dense<0.000000e+00> : vector<1xf32>
    %66 = vector.multi_reduction <add>, %65, %cst_30 [1, 2] : vector<1x4x1xf32> to vector<1xf32>
    %67 = vector.shape_cast %66 : vector<1xf32> to vector<1x1x1xf32>
    %68 = vector.extract %67[0, 0, 0] : f32 from vector<1x1x1xf32>
    %69 = vector.broadcast %68 : f32 to vector<1x1xf32>
    %70 = arith.addf %60, %69 : vector<1x1xf32>
    %71 = vector.extract_strided_slice %49 {offsets = [0, 32], sizes = [4, 16], strides = [1, 1]} : vector<4x64xf32> to vector<4x16xf32>
    %cst_31 = arith.constant dense<0.000000e+00> : vector<4xf32>
    %72 = vector.multi_reduction <add>, %71, %cst_31 [1] : vector<4x16xf32> to vector<4xf32>
    %73 = vector.shape_cast %72 : vector<4xf32> to vector<4x1xf32>
    %74 = math.sqrt %73 : vector<4x1xf32>
    %75 = vector.shape_cast %74 : vector<4x1xf32> to vector<1x4x1xf32>
    %cst_32 = arith.constant dense<0.000000e+00> : vector<1xf32>
    %76 = vector.multi_reduction <add>, %75, %cst_32 [1, 2] : vector<1x4x1xf32> to vector<1xf32>
    %77 = vector.shape_cast %76 : vector<1xf32> to vector<1x1x1xf32>
    %78 = vector.extract %77[0, 0, 0] : f32 from vector<1x1x1xf32>
    %79 = vector.broadcast %78 : f32 to vector<1x1xf32>
    %80 = arith.addf %70, %79 : vector<1x1xf32>
    %81 = vector.extract_strided_slice %49 {offsets = [0, 48], sizes = [4, 16], strides = [1, 1]} : vector<4x64xf32> to vector<4x16xf32>
    %cst_33 = arith.constant dense<0.000000e+00> : vector<4xf32>
    %82 = vector.multi_reduction <add>, %81, %cst_33 [1] : vector<4x16xf32> to vector<4xf32>
    %83 = vector.shape_cast %82 : vector<4xf32> to vector<4x1xf32>
    %84 = math.sqrt %83 : vector<4x1xf32>
    %85 = vector.shape_cast %84 : vector<4x1xf32> to vector<1x4x1xf32>
    %cst_34 = arith.constant dense<0.000000e+00> : vector<1xf32>
    %86 = vector.multi_reduction <add>, %85, %cst_34 [1, 2] : vector<1x4x1xf32> to vector<1xf32>
    %87 = vector.shape_cast %86 : vector<1xf32> to vector<1x1x1xf32>
    %88 = vector.extract %87[0, 0, 0] : f32 from vector<1x1x1xf32>
    %89 = vector.broadcast %88 : f32 to vector<1x1xf32>
    %90 = arith.addf %80, %89 : vector<1x1xf32>
    %c0_35 = arith.constant 0 : index
    %c0_36 = arith.constant 0 : index
    %91 = vector.load %arg13[%c0_35, %c0_36] : memref<1x1xf32, #tpu.memory_space<vmem>>, vector<1x1xf32>
    %92 = arith.addf %91, %90 : vector<1x1xf32>
    %c0_37 = arith.constant 0 : index
    %c0_38 = arith.constant 0 : index
    %93 = vector.load %arg13[%c0_37, %c0_38] : memref<1x1xf32, #tpu.memory_space<vmem>>, vector<1x1xf32>
    tpu.vector_store %arg13[%c0_37, %c0_38], %92 {strides = array<i32>} : memref<1x1xf32, #tpu.memory_space<vmem>>, vector<1x1xf32>,
    %c0_i32_39 = arith.constant 0 : i32
    %94 = arith.cmpi eq, %arg1, %c0_i32_39 : i32
    %95 = arith.extui %94 : i1 to i32
    %c0_i32_40 = arith.constant 0 : i32
    %96 = arith.cmpi ne, %95, %c0_i32_40 : i32
    scf.if %96 {
      %c0_41 = arith.constant 0 : index
      %c0_42 = arith.constant 0 : index
      %97 = vector.load %arg11[%c0_41, %c0_42] : memref<1x1xf32, #tpu.memory_space<vmem>>, vector<1x1xf32>
      %98 = vector.shape_cast %97 : vector<1x1xf32> to vector<1x1x1xf32>
      %c0_43 = arith.constant 0 : index
      %c0_44 = arith.constant 0 : index
      %c0_45 = arith.constant 0 : index
      %99 = vector.load %arg8[%c0_43, %c0_44, %c0_45] : memref<1x1x1xf32, #tpu.memory_space<vmem>>, vector<1x1x1xf32>
      tpu.vector_store %arg8[%c0_43, %c0_44, %c0_45], %98 {strides = array<i32>} : memref<1x1x1xf32, #tpu.memory_space<vmem>>, vector<1x1x1xf32>,
      %c0_46 = arith.constant 0 : index
      %c0_47 = arith.constant 0 : index
      %100 = vector.load %arg12[%c0_46, %c0_47] : memref<1x1xf32, #tpu.memory_space<vmem>>, vector<1x1xf32>
      %101 = vector.shape_cast %100 : vector<1x1xf32> to vector<1x1x1xf32>
      %c0_48 = arith.constant 0 : index
      %c0_49 = arith.constant 0 : index
      %c0_50 = arith.constant 0 : index
      %102 = vector.load %arg9[%c0_48, %c0_49, %c0_50] : memref<1x1x1xf32, #tpu.memory_space<vmem>>, vector<1x1x1xf32>
      tpu.vector_store %arg9[%c0_48, %c0_49, %c0_50], %101 {strides = array<i32>} : memref<1x1x1xf32, #tpu.memory_space<vmem>>, vector<1x1x1xf32>,
      %c0_51 = arith.constant 0 : index
      %c0_52 = arith.constant 0 : index
      %103 = vector.load %arg13[%c0_51, %c0_52] : memref<1x1xf32, #tpu.memory_space<vmem>>, vector<1x1xf32>
      %104 = vector.shape_cast %103 : vector<1x1xf32> to vector<1x1x1xf32>
      %c0_53 = arith.constant 0 : index
      %c0_54 = arith.constant 0 : index
      %c0_55 = arith.constant 0 : index
      %105 = vector.load %arg10[%c0_53, %c0_54, %c0_55] : memref<1x1x1xf32, #tpu.memory_space<vmem>>, vector<1x1x1xf32>
      tpu.vector_store %arg10[%c0_53, %c0_54, %c0_55], %104 {strides = array<i32>} : memref<1x1x1xf32, #tpu.memory_space<vmem>>, vector<1x1x1xf32>,
    } else {
    }
    return
  }
  func.func @transform_0(%arg0: i32, %arg1: i32) -> (i32, i32) {
    %c1_i32 = arith.constant 1 : i32
    %0 = arith.muli %arg0, %c1_i32 : i32
    %1 = arith.addi %0, %arg1 : i32
    %c0_i32 = arith.constant 0 : i32
    %c0_i32_0 = arith.constant 0 : i32
    return %1, %c0_i32 : i32, i32
  }
  func.func @transform_1(%arg0: i32, %arg1: i32) -> (i32, i32) {
    %c1_i32 = arith.constant 1 : i32
    %0 = arith.muli %arg0, %c1_i32 : i32
    %1 = arith.addi %0, %arg1 : i32
    %c0_i32 = arith.constant 0 : i32
    %c0_i32_0 = arith.constant 0 : i32
    return %1, %c0_i32 : i32, i32
  }
  func.func @transform_2(%arg0: i32, %arg1: i32) -> (i32, i32) {
    %c1_i32 = arith.constant 1 : i32
    %0 = arith.muli %arg0, %c1_i32 : i32
    %1 = arith.addi %0, %arg1 : i32
    %c0_i32 = arith.constant 0 : i32
    %c0_i32_0 = arith.constant 0 : i32
    return %1, %c0_i32 : i32, i32
  }
  func.func @transform_3(%arg0: i32, %arg1: i32) -> (i32, i32) {
    %c1_i32 = arith.constant 1 : i32
    %0 = arith.muli %arg0, %c1_i32 : i32
    %1 = arith.addi %0, %arg1 : i32
    %c0_i32 = arith.constant 0 : i32
    %c0_i32_0 = arith.constant 0 : i32
    return %1, %c0_i32 : i32, i32
  }
  func.func @transform_4(%arg0: i32, %arg1: i32) -> (i32, i32) {
    %c1_i32 = arith.constant 1 : i32
    %0 = arith.muli %arg0, %c1_i32 : i32
    %1 = arith.addi %0, %arg1 : i32
    %c0_i32 = arith.constant 0 : i32
    %c0_i32_0 = arith.constant 0 : i32
    return %1, %c0_i32 : i32, i32
  }
  func.func @transform_5(%arg0: i32, %arg1: i32) -> (i32, i32) {
    %c1_i32 = arith.constant 1 : i32
    %0 = arith.muli %arg0, %c1_i32 : i32
    %1 = arith.addi %0, %arg1 : i32
    %c0_i32 = arith.constant 0 : i32
    %c0_i32_0 = arith.constant 0 : i32
    return %1, %c0_i32 : i32, i32
  }
  func.func @transform_6(%arg0: i32, %arg1: i32) -> (i32, i32, i32) {
    %c0_i32 = arith.constant 0 : i32
    %c0_i32_0 = arith.constant 0 : i32
    %c0_i32_1 = arith.constant 0 : i32
    return %arg0, %c0_i32, %c0_i32_0 : i32, i32, i32
  }
  func.func @transform_7(%arg0: i32, %arg1: i32) -> (i32, i32, i32) {
    %c0_i32 = arith.constant 0 : i32
    %c0_i32_0 = arith.constant 0 : i32
    %c0_i32_1 = arith.constant 0 : i32
    return %arg0, %c0_i32, %c0_i32_0 : i32, i32, i32
  }
  func.func @transform_8(%arg0: i32, %arg1: i32) -> (i32, i32, i32) {
    %c0_i32 = arith.constant 0 : i32
    %c0_i32_0 = arith.constant 0 : i32
    %c0_i32_1 = arith.constant 0 : i32
    return %arg0, %c0_i32, %c0_i32_0 : i32, i32, i32
  }
}

</mosaic_0001>

<bundles_post_ra>
// kernel: tpu_custom_call.1
= control target key start
LH: loop header
LB: loop body
LE: loop exit
PB: predicated region body
PF: predicated region fallthrough
CT: control target
= control target key end

     0   :  { %14 = vsyncpa [#allocation6], 0  ;;  %s646_s0 = inlined_call_operand.hbm [shape: f32[1,128], index: 0, kind: input, shape index: {}]   ;;  %s647_s1 = inlined_call_operand.vmem [shape: f32[1,128], index: 1, kind: input, shape index: {}]   ;;  %s648_s2 = inlined_call_operand.vmem [shape: f32[4,6], index: 2, kind: input, shape index: {}]   ;;  %s649_s3 = inlined_call_operand.vmem [shape: f32[4,6], index: 3, kind: input, shape index: {}]   ;;  %s650_s4 = inlined_call_operand.vmem [shape: f32[4,6], index: 4, kind: input, shape index: {}]   ;;  %s651_s5 = inlined_call_operand.vmem [shape: f32[4,80], index: 5, kind: input, shape index: {}]   ;;  %s652_s6 = inlined_call_operand.hbm [shape: f32[1,1,1], index: 6, kind: output, shape index: {0}]   ;;  %s653_s7 = inlined_call_operand.hbm [shape: f32[1,1,1], index: 7, kind: output, shape index: {1}]   ;;  %s654_s8 = inlined_call_operand.hbm [shape: f32[1,1,1], index: 8, kind: output, shape index: {2}]  }
   0x1   :  { %15 = vsyncpa [#allocation7], 0 }
   0x2   :  { %16 = vsyncpa [#allocation10], 0  ;;  %s511_s27 = smov [#allocation5]   ;;  %s417_s9 = scalar_lea.hbm %s646_s0, 16 }
   0x3   :  { %s26_s28 = sshll.u32 %s511_s27, 4  ;;  %p418_p0 = scmp.ne.s32.totalorder %s646_s0, %s417_s9  ;;  %s27_s28 = int_to_ptr.vmem [resolvable:$true] %s26_s28 }
   0x4   :  { %p421_p1 = scmp.lt.u32.totalorder %s417_s9, %s646_s0 }
   0x6   :  { %p423_p2 = pnand %p421_p1, %p418_p0 }
   0x8   :  { %426 = shalt.err (!%p423_p2)
}
   0x9   :  { %s427_s14 = scalar_lea.vmem %s27_s28, 16  ;;  %s431_s15 = scalar_lea.vmem %s27_s28, 32 }
   0xa   :  { %p428_p3 = scmp.ne.s32.totalorder %s27_s28, %s427_s14  ;;  %p432_p4 = scmp.lt.s32.totalorder %s27_s28, %s27_s28 }
   0xb   :  { %p433_p5 = scmp.lt.s32.totalorder %s431_s15, %s427_s14 }
   0xd   :  { %p434_p6 = por %p433_p5, %p432_p4 }
   0xf   :  { %p435_p7 = pnand %p434_p6, %p428_p3 }
  0x11   :  { %438 = shalt.err (!%p435_p7)
}
  0x12   :  { %29 = dma.hbm_to_vmem [thread:$0]  %s646_s0, 16, %s27_s28, [#allocation6]  }
  0x13   :  { %505 = dma.done.wait [#allocation6], 16  }
  0x14   :  { %506 = vsyncadd [#allocation6], 4294967280  ;;  %v193_v0 = vld [vmem:[%s651_s5] sm:$0xf]  ;;  %s512_s20 = smov 16   ;;  %s513_s21 = smov 96  }
  0x15   :  { %195 = vrot.lane.b32.xlu0 %v193_v0, %s512_s20  ;;  %s514_s22 = smov 112   ;;  %s515_s23 = smov 80   ;;  %v154_v4 = vld [vmem:[%s650_s4] sm:$0xf]  ;;  %vm160_vm0 = vcmask 44032   ;;  %vm204_vm1 = vcmask 125952  }
  0x16   :  { %s516_s24 = smov 64   ;;  %v157_v5 = vld [vmem:[%s649_s3] sm:$0xf]  ;;  %vm139_vm2 = vcmask 1040384   ;;  %vm179_vm3 = vcmask 3072   ;;  %vm130_vm12 = vcmask 0  }
  0x17   :  { %v158_v6 = vsub.f32 %v154_v4, %v157_v5  ;;  %v155_v7 = vld [vmem:[%s648_s2] sm:$0xf]  ;;  %s518_s4 = smov [#allocation8]  }
  0x18   :  { %v156_v9 = vsub.f32 %v154_v4, %v155_v7  ;;  %v134_v23 = vld [vmem:[#allocation5] sm:$0x1]  ;;  %v135_v24 = vld [vmem:[%s647_s1] sm:$0x1]  ;;  %s320_s29 = sshll.u32 %s518_s4, 4  ;;  %s321_s29 = int_to_ptr.vmem [resolvable:$true] %s320_s29 }
  0x19   :  { %v168_v8 = vmul.f32 %v158_v6, %v158_v6  ;;  %v136_v25 = vsub.f32 %v134_v23, %v135_v24  ;;  %s439_s30 = scalar_lea.vmem %s321_s29, 16  ;;  %s443_s9 = scalar_lea.vmem %s321_s29, 32 }
  0x1a   :  { %v164_v11 = vmul.f32 %v156_v9, %v156_v9  ;;  %v159_v17 = vmul.f32 %v158_v6, %v156_v9  ;;  %v517_v9 = vmov 0.0   ;;  %p440_p8 = scmp.ne.s32.totalorder %s321_s29, %s439_s30  ;;  %p444_p9 = scmp.lt.s32.totalorder %s321_s29, %s321_s29 }
  0x1b   :  { %v169_v10 = vsel %vm160_vm0, %v168_v8, 0.0  ;;  %v138_v26 = vmul.f32 %v136_v25, %v136_v25  ;;  %131 = vst.msk [vmem:[#allocation2] sm:$0x1] %vm130_vm12, %v517_v9  ;;  %132 = vst.msk [vmem:[#allocation3] sm:$0x1] %vm130_vm12, %v517_v9  ;;  %p445_p10 = scmp.lt.s32.totalorder %s443_s9, %s439_s30 }
  0x1c   :  { %v165_v12 = vsel %vm160_vm0, %v164_v11, 0.0  ;;  %v161_v22 = vsel %vm160_vm0, %v159_v17, 0.0  ;;  %133 = vst.msk [vmem:[#allocation4] sm:$0x1] %vm130_vm12, %v517_v9 }
  0x1d   :  { %v140_v27 = vsel %vm139_vm2, %v138_v26, 0.0  ;;  %p446_p11 = por %p445_p10, %p444_p9 }
  0x1f   :  { %p447_p12 = pnand %p446_p11, %p440_p8 }
  0x87   :  { %v196_v1 = vpop.permute.xlu0 %195 }
  0x88   :  { %v198_v2 = vsub.f32 %v193_v0, %v196_v1 }
  0x8a   :  { %v199_v3 = vmul.f32 %v198_v2, %v198_v2 }
  0x8c   :  { %227 = vrot.lane.b32.xlu1 %v199_v3, %s513_s21  ;;  %201 = vrot.lane.b32.xlu0 %v199_v3, %s514_s22 }
  0x90   :  { %252 = vrot.lane.b32.xlu1 %v199_v3, %s515_s23  ;;  %277 = vrot.lane.b32.xlu0 %v199_v3, %s516_s24 }
  0xaf   :  { %170 = vadd.xlane.f32.xlu0 %v169_v10  ;;  %v137_v10 = vld [vmem:[#allocation2] sm:$0x1] }
  0xb4   :  { %166 = vadd.xlane.f32.xlu1 %v165_v12 }
  0xfe   :  { %v228_v13 = vpop.permute.xlu1 %227  ;;  %v202_v14 = vpop.permute.xlu0 %201 }
  0xff   :  { %v205_v15 = vsel %vm204_vm1, %v202_v14, 0.0  ;;  %v230_v16 = vsel %vm204_vm1, %v228_v13, 0.0 }
 0x100   :  { %206 = vadd.xlane.f32.xlu0 %v205_v15  ;;  %231 = vadd.xlane.f32.xlu1 %v230_v16 }
 0x102   :  { %v253_v18 = vpop.permute.xlu1 %252  ;;  %v278_v19 = vpop.permute.xlu0 %277 }
 0x103   :  { %v255_v20 = vsel %vm204_vm1, %v253_v18, 0.0  ;;  %v280_v21 = vsel %vm204_vm1, %v278_v19, 0.0 }
 0x104   :  { %256 = vadd.xlane.f32.xlu0 %v255_v20  ;;  %281 = vadd.xlane.f32.xlu1 %v280_v21 }
 0x108   :  { %162 = vadd.xlane.f32.xlu0 %v161_v22  ;;  %141 = vadd.xlane.f32.xlu1 %v140_v27 }
 0x13c   :  { %v171_v29 = vpop.xlane.xlu0 %170 }
 0x13d   :  { %v175_v31 = vmax.f32 %v171_v29, 1e-24 }
 0x141   :  { %v167_v28 = vpop.xlane.xlu1 %166 }
 0x142   :  { %v172_v30 = vmax.f32 %v167_v28, 1e-24 }
 0x144   :  { %405 = vrsqrt.f32 %v172_v30 }
 0x145   :  { %407 = vrsqrt.f32 %v175_v31 }
 0x14e   :  { %v406_v36 = vpop.eup %405 }
 0x14f   :  { %v408_v37 = vpop.eup %407 }
 0x18d   :  { %v207_v32 = vpop.xlane.xlu0 %206  ;;  %v232_v33 = vpop.xlane.xlu1 %231 }
 0x18e   :  { %409 = vrsqrt.f32 %v207_v32  ;;  %vm210_vm4 = vcmp.eq.f32.partialorder %v207_v32, inf  ;;  %v213_v45 = vand.u32 2147483648, %v207_v32  ;;  %vm212_vm5 = vcmp.eq.f32.partialorder %v207_v32, 0.0 }
 0x18f   :  { %411 = vrsqrt.f32 %v232_v33  ;;  %vm235_vm6 = vcmp.eq.f32.partialorder %v232_v33, inf  ;;  %v238_v48 = vand.u32 2147483648, %v232_v33  ;;  %vm237_vm7 = vcmp.eq.f32.partialorder %v232_v33, 0.0 }
 0x191   :  { %v257_v34 = vpop.xlane.xlu0 %256  ;;  %v282_v35 = vpop.xlane.xlu1 %281 }
 0x192   :  { %413 = vrsqrt.f32 %v257_v34  ;;  %vm260_vm8 = vcmp.eq.f32.partialorder %v257_v34, inf  ;;  %v263_v57 = vand.u32 2147483648, %v257_v34  ;;  %vm262_vm9 = vcmp.eq.f32.partialorder %v257_v34, 0.0 }
 0x193   :  { %415 = vrsqrt.f32 %v282_v35  ;;  %vm285_vm10 = vcmp.eq.f32.partialorder %v282_v35, inf  ;;  %v288_v60 = vand.u32 2147483648, %v282_v35  ;;  %vm287_vm11 = vcmp.eq.f32.partialorder %v282_v35, 0.0 }
 0x195   :  { %v163_v38 = vpop.xlane.xlu0 %162  ;;  %v142_v2 = vpop.xlane.xlu1 %141 }
 0x196   :  { %v174_v39 = vmul.f32 %v406_v36, %v163_v38  ;;  %v143_v3 = vrot.slane %v142_v2, 4 }
 0x198   :  { %v410_v40 = vpop.eup %409  ;;  %v177_v41 = vmul.f32 %v408_v37, %v174_v39  ;;  %v144_v4 = vadd.f32 %v143_v3, %v142_v2 }
 0x199   :  { %v412_v42 = vpop.eup %411  ;;  %v209_v43 = vmul.f32 %v410_v40, %v207_v32 }
 0x19a   :  { %v180_v44 = vsel %vm179_vm3, %v177_v41, 0.0  ;;  %v234_v46 = vmul.f32 %v412_v42, %v232_v33  ;;  %v145_v5 = vrot.slane %v144_v4, 2 }
 0x19b   :  { %181 = vadd.xlane.f32.xlu0 %v180_v44  ;;  %v211_v47 = vsel %vm210_vm4, %v207_v32, %v209_v43 }
 0x19c   :  { %v414_v49 = vpop.eup %413  ;;  %v214_v50 = vsel %vm212_vm5, %v213_v45, %v211_v47  ;;  %v236_v51 = vsel %vm235_vm6, %v232_v33, %v234_v46  ;;  %v146_v6 = vadd.f32 %v145_v5, %v144_v4 }
 0x19d   :  { %v416_v52 = vpop.eup %415  ;;  %v215_v53 = vsel %vm179_vm3, %v214_v50, 0.0  ;;  %v239_v54 = vsel %vm237_vm7, %v238_v48, %v236_v51  ;;  %v259_v55 = vmul.f32 %v414_v49, %v257_v34 }
 0x19e   :  { %216 = vadd.xlane.f32.xlu1 %v215_v53  ;;  %v240_v56 = vsel %vm179_vm3, %v239_v54, 0.0  ;;  %v284_v58 = vmul.f32 %v416_v52, %v282_v35  ;;  %v147_v7 = vrot.slane %v146_v6, 1 }
 0x19f   :  { %241 = vadd.xlane.f32.xlu0 %v240_v56  ;;  %v261_v59 = vsel %vm260_vm8, %v257_v34, %v259_v55 }
 0x1a0   :  { %v264_v61 = vsel %vm262_vm9, %v263_v57, %v261_v59  ;;  %v286_v62 = vsel %vm285_vm10, %v282_v35, %v284_v58  ;;  %v148_v8 = vadd.f32 %v147_v7, %v146_v6 }
 0x1a1   :  { %v265_v63 = vsel %vm179_vm3, %v264_v61, 0.0  ;;  %v289_v0 = vsel %vm287_vm11, %v288_v60, %v286_v62 }
 0x1a2   :  { %266 = vadd.xlane.f32.xlu1 %v265_v63  ;;  %v290_v1 = vsel %vm179_vm3, %v289_v0, 0.0  ;;  %383 = vpush %v148_v8 }
 0x1a3   :  { %291 = vadd.xlane.f32.xlu0 %v290_v1 }
 0x1d3   :  { %s384_s1 = spop %383 }
 0x1d4   :  { %v150_v11 = vstv %s384_s1 }
 0x1d5   :  { %v151_v12 = vadd.f32 %v150_v11, %v137_v10 }
 0x1d7   :  { %153 = vst.msk [vmem:[#allocation2] sm:$0x1] %vm130_vm12, %v151_v12 }
 0x1de   :  { %v308_v13 = vld [vmem:[#allocation2] sm:$0x1] }
 0x1df   :  { %309 = vst.msk [vmem:[#allocation8] sm:$0x1] %vm130_vm12, %v308_v13 }
 0x1e0   :  { %450 = shalt.err (!%p447_p12)
}
 0x1e1   :  { %s451_s12 = scalar_lea.hbm %s652_s6, 16 }
 0x1e2   :  { %p452_p13 = scmp.ne.s32.totalorder %s652_s6, %s451_s12  ;;  %p455_p0 = scmp.lt.u32.totalorder %s451_s12, %s652_s6 }
 0x1e4   :  { %p457_p1 = pnand %p455_p0, %p452_p13 }
 0x1e6   :  { %460 = shalt.err (!%p457_p1)
}
 0x1e7   :  { %323 = dma.vmem_to_hbm [thread:$0]  %s321_s29, 16, %s652_s6, [#allocation7]   ;;  %v178_v49 = vld [vmem:[#allocation3] sm:$0x1]  ;;  %v302_v58 = vld [vmem:[#allocation4] sm:$0x1] }
 0x1e8   :  { %s519_s22 = smov [#allocation9]  }
 0x1e9   :  { %s330_s23 = sshll.u32 %s519_s22, 4  ;;  %s331_s23 = int_to_ptr.vmem [resolvable:$true] %s330_s23 }
 0x1ea   :  { %s461_s0 = scalar_lea.vmem %s331_s23, 16  ;;  %s465_s25 = scalar_lea.vmem %s331_s23, 32 }
 0x1eb   :  { %p462_p2 = scmp.ne.s32.totalorder %s331_s23, %s461_s0  ;;  %p466_p3 = scmp.lt.s32.totalorder %s331_s23, %s331_s23 }
 0x1ec   :  { %p467_p4 = scmp.lt.s32.totalorder %s465_s25, %s461_s0 }
 0x1ee   :  { %p468_p5 = por %p467_p4, %p466_p3 }
 0x1f0   :  { %p469_p6 = pnand %p468_p5, %p462_p2 }
 0x228   :  { %v182_v14 = vpop.xlane.xlu0 %181 }
 0x229   :  { %v183_v15 = vrot.slane %v182_v14, 4 }
 0x22b   :  { %v184_v16 = vadd.f32 %v183_v15, %v182_v14  ;;  %v217_v17 = vpop.xlane.xlu1 %216 }
 0x22c   :  { %v218_v18 = vrot.slane %v217_v17, 4  ;;  %v242_v19 = vpop.xlane.xlu0 %241 }
 0x22d   :  { %v185_v20 = vrot.slane %v184_v16, 2  ;;  %v243_v21 = vrot.slane %v242_v19, 4 }
 0x22e   :  { %v219_v22 = vadd.f32 %v218_v18, %v217_v17 }
 0x22f   :  { %v244_v23 = vadd.f32 %v243_v21, %v242_v19  ;;  %v267_v24 = vpop.xlane.xlu1 %266  ;;  %v186_v25 = vadd.f32 %v185_v20, %v184_v16 }
 0x230   :  { %v220_v26 = vrot.slane %v219_v22, 2  ;;  %v268_v27 = vrot.slane %v267_v24, 4  ;;  %v292_v28 = vpop.xlane.xlu0 %291 }
 0x231   :  { %v245_v29 = vrot.slane %v244_v23, 2  ;;  %v293_v30 = vrot.slane %v292_v28, 4  ;;  %v187_v31 = vrot.slane %v186_v25, 1 }
 0x232   :  { %v269_v32 = vadd.f32 %v268_v27, %v267_v24  ;;  %v221_v33 = vadd.f32 %v220_v26, %v219_v22 }
 0x233   :  { %v294_v34 = vadd.f32 %v293_v30, %v292_v28  ;;  %v188_v35 = vadd.f32 %v187_v31, %v186_v25  ;;  %v246_v36 = vadd.f32 %v245_v29, %v244_v23 }
 0x234   :  { %v270_v37 = vrot.slane %v269_v32, 2  ;;  %v222_v38 = vrot.slane %v221_v33, 1 }
 0x235   :  { %v295_v39 = vrot.slane %v294_v34, 2  ;;  %385 = vpush %v188_v35  ;;  %v247_v40 = vrot.slane %v246_v36, 1 }
 0x236   :  { %v271_v41 = vadd.f32 %v270_v37, %v269_v32  ;;  %v223_v42 = vadd.f32 %v222_v38, %v221_v33 }
 0x237   :  { %v296_v43 = vadd.f32 %v295_v39, %v294_v34  ;;  %v248_v44 = vadd.f32 %v247_v40, %v246_v36 }
 0x238   :  { %387 = vpush %v223_v42  ;;  %v272_v45 = vrot.slane %v271_v41, 1 }
 0x239   :  { %389 = vpush %v248_v44  ;;  %v297_v46 = vrot.slane %v296_v43, 1 }
 0x23a   :  { %v273_v47 = vadd.f32 %v272_v45, %v271_v41 }
 0x23b   :  { %v298_v48 = vadd.f32 %v297_v46, %v296_v43 }
 0x23c   :  { %391 = vpush %v273_v47 }
 0x23d   :  { %393 = vpush %v298_v48 }
 0x266   :  { %s386_s6 = spop %385 }
 0x267   :  { %v190_v50 = vstv %s386_s6 }
 0x268   :  { %v191_v51 = vadd.f32 %v190_v50, %v178_v49 }
 0x269   :  { %s388_s19 = spop %387 }
 0x26a   :  { %192 = vst.msk [vmem:[#allocation3] sm:$0x1] %vm130_vm12, %v191_v51  ;;  %v225_v52 = vstv %s388_s19  ;;  %s390_s20 = spop %389 }
 0x26b   :  { %v250_v53 = vstv %s390_s20 }
 0x26c   :  { %v251_v54 = vadd.f32 %v250_v53, %v225_v52 }
 0x26d   :  { %s392_s21 = spop %391 }
 0x26e   :  { %v275_v55 = vstv %s392_s21  ;;  %s394_s24 = spop %393 }
 0x26f   :  { %v276_v56 = vadd.f32 %v275_v55, %v251_v54  ;;  %v300_v57 = vstv %s394_s24 }
 0x271   :  { %v301_v59 = vadd.f32 %v300_v57, %v276_v56  ;;  %v310_v60 = vld [vmem:[#allocation3] sm:$0x1] }
 0x272   :  { %311 = vst.msk [vmem:[#allocation9] sm:$0x1] %vm130_vm12, %v310_v60 }
 0x273   :  { %v303_v61 = vadd.f32 %v302_v58, %v301_v59 }
 0x274   :  { %472 = shalt.err (!%p469_p6)
}
 0x275   :  { %s473_s5 = scalar_lea.hbm %s653_s7, 16 }
 0x276   :  { %p474_p7 = scmp.ne.s32.totalorder %s653_s7, %s473_s5  ;;  %p477_p8 = scmp.lt.u32.totalorder %s473_s5, %s653_s7 }
 0x278   :  { %p479_p9 = pnand %p477_p8, %p474_p7 }
 0x27a   :  { %482 = shalt.err (!%p479_p9)
}
 0x27b   :  { %333 = dma.vmem_to_hbm [thread:$0]  %s331_s23, 16, %s653_s7, [#allocation10]   ;;  %304 = vst.msk [vmem:[#allocation4] sm:$0x1] %vm130_vm12, %v303_v61 }
 0x27c   :  { %s520_s30 = smov [#allocation11]  }
 0x27d   :  { %s340_s9 = sshll.u32 %s520_s30, 4  ;;  %s341_s9 = int_to_ptr.vmem [resolvable:$true] %s340_s9 }
 0x27e   :  { %s483_s10 = scalar_lea.vmem %s341_s9, 16  ;;  %s487_s11 = scalar_lea.vmem %s341_s9, 32 }
 0x27f   :  { %p484_p10 = scmp.ne.s32.totalorder %s341_s9, %s483_s10  ;;  %p488_p11 = scmp.lt.s32.totalorder %s341_s9, %s341_s9 }
 0x280   :  { %p489_p12 = scmp.lt.s32.totalorder %s487_s11, %s483_s10 }
 0x282   :  { %v312_v62 = vld [vmem:[#allocation4] sm:$0x1]  ;;  %p490_p13 = por %p489_p12, %p488_p11 }
 0x283   :  { %313 = vst.msk [vmem:[#allocation11] sm:$0x1] %vm130_vm12, %v312_v62 }
 0x284   :  { %p491_p0 = pnand %p490_p13, %p484_p10 }
 0x286   :  { %494 = shalt.err (!%p491_p0)
}
 0x287   :  { %s495_s7 = scalar_lea.hbm %s654_s8, 16 }
 0x288   :  { %p496_p1 = scmp.ne.s32.totalorder %s654_s8, %s495_s7  ;;  %p499_p2 = scmp.lt.u32.totalorder %s495_s7, %s654_s8 }
 0x28a   :  { %p501_p3 = pnand %p499_p2, %p496_p1 }
 0x28c   :  { %504 = shalt.err (!%p501_p3)
}
 0x28d   :  { %343 = dma.vmem_to_hbm [thread:$0]  %s341_s9, 16, %s654_s8, [#allocation10]  }
 0x28e   :  { %507 = dma.done.wait [#allocation7], 16  }
 0x28f   :  { %508 = vsyncadd [#allocation7], 4294967280 }
 0x290   :  { %509 = dma.done.wait [#allocation10], 32  }
 0x291   :  { %510 = vsyncadd [#allocation10], 4294967264 }
 0x292   :  { %353 = vsyncpa [#allocation6], 1 }
 0x293   :  { %354 = vsyncpa [#allocation7], 1 }
 0x294   :  { %355 = vsyncpa [#allocation10], 1 }

</bundles_post_ra>
